<compile_context>
chip_gen: v6e
topology: v6e:2x2x1
jax: 0.10.0
libtpu: 0.0.40
codegen_flags: <defaults>
</compile_context>

<pallas_src>
import functools

import jax
import jax.numpy as jnp
from jax.experimental import pallas as pl
from jax.experimental.pallas import tpu as pltpu


def _round_up(x, m):
    return ((x + m - 1) // m) * m


def _pick_spatial_tiling(S, target_ts, K):
    """Choose (S_pad, ts, chunk): avoid padding whenever possible."""
    if S % 128 == 0:
        # Largest multiple of 128 that divides S and is <= target.
        ts, t = 128, 128
        while t <= min(target_ts, S):
            if S % t == 0:
                ts = t
            t += 128
        S_pad = S
    elif S <= 4096:
        # Small / odd spatial extent: one full-width tile (block == full dim).
        ts, S_pad = S, S
    else:
        # Fallback: pad to a lane multiple (costs an extra HBM pass).
        S_pad = _round_up(S, 128)
        ts, t = 128, 128
        while t <= min(target_ts, S_pad):
            if S_pad % t == 0:
                ts = t
            t += 128
    if ts % 128 == 0:
        chunk = 256 if K <= 128 else 128     # keep (K, chunk) register-resident
        chunk = min(chunk, ts)
        while ts % chunk != 0:
            chunk -= 128
    else:
        chunk = ts
    return S_pad, ts, chunk


def _vq_kernel(x_ref, wd_ref, wt_ref, w2_ref,          # inputs
               out_ref, counts_ref, sse_ref,            # outputs
               *, chunk, s_valid, masked):
    """Quantize one (C, TS) spatial slab of one batch element.

    x_ref:      (C, TS)    inputs, channels on sublanes, spatial on lanes
    wd_ref:     (K, C)     codebook in distance-matmul dtype (bf16 fast / f32)
    wt_ref:     (C, K)     codebook^T in gather-matmul dtype (== output dtype)
    w2_ref:     (K, 1)     precomputed ||w_k||^2 (f32)
    out_ref:    (C, TS)    quantized output
    counts_ref: (K, CHUNK) per-batch lane-partial code counts (VMEM-resident)
    sse_ref:    (1, CHUNK) per-batch lane-partial sum of squared errors
    """
    s = pl.program_id(1)
    ts = x_ref.shape[1]
    k = wd_ref.shape[0]
    n_chunks = ts // chunk

    @pl.when(s == 0)
    def _():
        counts_ref[...] = jnp.zeros_like(counts_ref)
        sse_ref[...] = jnp.zeros_like(sse_ref)

    # Hoisted (JAX does not CSE broadcast_in_dim; build iotas once).
    iota_k = jax.lax.broadcasted_iota(jnp.int32, (k, 1), 0)          # (K, 1)
    if masked:
        col_local = jax.lax.broadcasted_iota(jnp.int32, (1, chunk), 1)
    w2 = w2_ref[...]                                                  # (K, 1)

    # Static, fully-inlined chunk loop: bounds the live (K, chunk) working set.
    for c in range(n_chunks):
        c0 = c * chunk
        xc = x_ref[:, c0:c0 + chunk]                  # single load of the tile slice
        xd = xc.astype(wd_ref.dtype)
        x32 = xc.astype(jnp.float32)

        # argmin_k ||x - w_k||^2 == argmin_k (||w_k||^2 - 2 w_k.x); ||x||^2 is
        # per-column constant and only needed for the SSE below.
        xw = jnp.dot(wd_ref[...], xd, preferred_element_type=jnp.float32)   # (K, chunk)
        dist = w2 - 2.0 * xw
        dmin = jnp.min(dist, axis=0, keepdims=True)                         # (1, chunk)
        # First-minimum index (matches torch.argmax(-dist) tie-break).
        idx = jnp.min(jnp.where(dist == dmin, iota_k, k), axis=0, keepdims=True)
        sel = iota_k == idx                                                  # (K, chunk)

        # Gather codebook rows on the MXU: q[:, j] = w[idx[j], :].
        q = jnp.dot(wt_ref[...], sel.astype(wt_ref.dtype),
                    preferred_element_type=jnp.float32)                      # (C, chunk)
        # Forward value of x + (q - x).detach() is just q.
        out_ref[:, c0:c0 + chunk] = q.astype(out_ref.dtype)

        # Per-column SSE from the expansion: ||x - w_idx||^2 = ||x||^2 + dmin.
        x2 = jnp.sum(x32 * x32, axis=0, keepdims=True)                       # (1, chunk)
        sse_c = x2 + dmin
        cnt_c = sel.astype(jnp.float32)

        if masked:
            valid = ((col_local + (s * ts + c0)) < s_valid).astype(jnp.float32)
            sse_c = sse_c * valid
            cnt_c = cnt_c * valid

        # Lane-partial accumulation (pure VALU adds) into the VMEM-resident
        # output blocks; written back to HBM once per batch element.
        counts_ref[...] += cnt_c
        sse_ref[...] += sse_c


def vector_quantizer_forward(inputs_nchw, codebook, commitment_cost=0.25,
                             tile_s=1024, dist_dtype=jnp.bfloat16):
    """VectorQuantizer forward. Returns (output_quantized, loss, perplexity).

    dist_dtype: dtype of the distance matmul (bf16 = MXU-native fast path;
    pass jnp.float32 for exact parity with an f32 reference — the bf16 path
    may flip near-tie assignments and the loss inherits ~bf16 matmul error).
    """
    B, C, H, W = inputs_nchw.shape
    K, D = codebook.shape
    assert C == D, "channel dim must equal embedding_dim"

    S = H * W
    x = inputs_nchw.reshape(B, C, S)                   # free contiguous view (stays NCHW)

    S_pad, ts, chunk = _pick_spatial_tiling(S, tile_s, K)
    masked = S_pad != S
    if masked:
        x = jnp.pad(x, ((0, 0), (0, 0), (0, S_pad - S)))

    w32 = codebook.astype(jnp.float32)
    w_dist = w32.astype(dist_dtype)                    # (K, D) distance matmul operand
    gather_dtype = jnp.bfloat16 if inputs_nchw.dtype == jnp.bfloat16 else jnp.float32
    w_t = jnp.transpose(w32).astype(gather_dtype)      # (D, K) one-hot gather operand
    w2 = jnp.sum(w32 * w32, axis=1, keepdims=True)     # (K, 1) precomputed ||w||^2

    kernel = functools.partial(_vq_kernel, chunk=chunk, s_valid=S, masked=masked)

    out, counts_b, sse_b = pl.pallas_call(
        kernel,
        out_shape=(
            jax.ShapeDtypeStruct((B, C, S_pad), inputs_nchw.dtype),
            jax.ShapeDtypeStruct((B, K, chunk), jnp.float32),
            jax.ShapeDtypeStruct((B, 1, chunk), jnp.float32),
        ),
        grid_spec=pltpu.PrefetchScalarGridSpec(
            num_scalar_prefetch=0,
            grid=(B, S_pad // ts),
            in_specs=[
                pl.BlockSpec((None, C, ts), lambda b, s: (b, 0, s)),   # x tile
                pl.BlockSpec((K, D), lambda b, s: (0, 0)),             # codebook
                pl.BlockSpec((D, K), lambda b, s: (0, 0)),             # codebook^T
                pl.BlockSpec((K, 1), lambda b, s: (0, 0)),             # ||w||^2
            ],
            out_specs=[
                pl.BlockSpec((None, C, ts), lambda b, s: (b, 0, s)),      # quantized
                pl.BlockSpec((None, K, chunk), lambda b, s: (b, 0, 0)),   # counts (lane-partial)
                pl.BlockSpec((None, 1, chunk), lambda b, s: (b, 0, 0)),   # sse (lane-partial)
            ],
        ),
        compiler_params=pltpu.CompilerParams(
            dimension_semantics=("parallel", "arbitrary")),
    )(x, w_dist, w_t, w2)

    if masked:
        out = out[:, :, :S]
    output_quantized = out.reshape(B, C, H, W)

    N = B * S
    counts = jnp.sum(counts_b, axis=(0, 2))            # (K,)
    sse = jnp.sum(sse_b)

    # e_latent_loss == q_latent_loss numerically in the forward pass.
    mse = sse / (N * D)
    loss = (1.0 + commitment_cost) * mse

    avg_probs = counts / N
    perplexity = jnp.exp(-jnp.sum(avg_probs * jnp.log(avg_probs + 1e-10)))
    # TODO(synk): the straight-through (detach) gradient routing is an autodiff
    # concern handled outside this forward kernel.
    return output_quantized, loss, perplexity


def _reference_forward(inputs_nchw, codebook, commitment_cost=0.25):
    """Pure-JAX reference mirroring the PyTorch module."""
    B, C, H, W = inputs_nchw.shape
    K, D = codebook.shape
    diff = inputs_nchw[:, None] - codebook.reshape(1, K, D, 1, 1)
    distances = jnp.sum(diff ** 2, axis=2)             # (B, K, H, W)
    idx = jnp.argmax(-distances, axis=1)               # (B, H, W)
    quantized = codebook[idx]                          # (B, H, W, C)
    quantized = jnp.transpose(quantized, (0, 3, 1, 2))
    out = inputs_nchw + (quantized - inputs_nchw)
    mse = jnp.mean((quantized - inputs_nchw) ** 2)
    loss = (1.0 + commitment_cost) * mse
    onehot = jax.nn.one_hot(idx.reshape(-1), K, dtype=jnp.float32)
    avg_probs = jnp.mean(onehot, axis=0)
    perplexity = jnp.exp(-jnp.sum(avg_probs * jnp.log(avg_probs + 1e-10)))
    return out, loss, perplexity


if __name__ == "__main__":
    embedding_dim = 32
    num_embeddings = 64
    commitment_cost = 0.25

    key = jax.random.PRNGKey(0)
    k_w, k_x1, k_x2, k_i, k_n = jax.random.split(key, 5)
    codebook = jax.random.normal(k_w, (num_embeddings, embedding_dim), jnp.float32)

    # --- Test 1: exact parity, odd small spatial extent (S = 8*8 = 64 < 128):
    #     single full-width tile, no padding, single chunk.
    x1 = jax.random.normal(k_x1, (2, embedding_dim, 8, 8), jnp.float32)
    r_q, r_loss, r_ppl = _reference_forward(x1, codebook, commitment_cost)
    o_q, loss, ppl = vector_quantizer_forward(
        x1, codebook, commitment_cost=commitment_cost, dist_dtype=jnp.float32)
    jax.block_until_ready((o_q, loss, ppl))
    assert o_q.shape == x1.shape
    assert jnp.allclose(o_q, r_q, atol=1e-4, rtol=1e-4)
    assert jnp.allclose(loss, r_loss, atol=1e-5, rtol=1e-4)
    assert jnp.allclose(ppl, r_ppl, atol=1e-4, rtol=1e-4)

    # --- Test 2: exact parity on a multi-step, multi-chunk configuration
    #     (S = 1024, tile_s=512 -> 2 spatial grid steps x 2 lane chunks).
    #     Inputs sit near codebook rows so assignments are unambiguous.
    idx_true = jax.random.randint(k_i, (2, 32, 32), 0, num_embeddings)
    x2 = (jnp.transpose(codebook[idx_true], (0, 3, 1, 2))
          + 0.25 * jax.random.normal(k_n, (2, embedding_dim, 32, 32), jnp.float32))
    r_q2, r_loss2, r_ppl2 = _reference_forward(x2, codebook, commitment_cost)
    o_q2, loss2, ppl2 = vector_quantizer_forward(
        x2, codebook, commitment_cost=commitment_cost,
        tile_s=512, dist_dtype=jnp.float32)
    jax.block_until_ready((o_q2, loss2, ppl2))
    assert o_q2.shape == x2.shape
    assert jnp.allclose(o_q2, r_q2, atol=1e-4, rtol=1e-4)
    assert jnp.allclose(loss2, r_loss2, atol=1e-5, rtol=1e-4)
    assert jnp.allclose(ppl2, r_ppl2, atol=1e-4, rtol=1e-4)

    # --- Test 3: default bf16 distance fast path (loose checks: near-tie
    #     assignments may flip, loss inherits ~bf16 matmul error).
    x3 = jax.random.normal(k_x2, (2, embedding_dim, 32, 32), jnp.float32)
    r_q3, r_loss3, r_ppl3 = _reference_forward(x3, codebook, commitment_cost)
    o_q3, loss3, ppl3 = vector_quantizer_forward(
        x3, codebook, commitment_cost=commitment_cost)
    jax.block_until_ready((o_q3, loss3, ppl3))
    assert o_q3.shape == x3.shape
    assert bool(jnp.all(jnp.isfinite(o_q3)))
    assert jnp.allclose(loss3, r_loss3, rtol=5e-2)
    assert jnp.allclose(ppl3, r_ppl3, rtol=1e-1)

    print("KERNEL_OK")
</pallas_src>

<mosaic_0001>
module attributes {stable_mosaic.version = 11 : i64} {
  func.func @_vq_kernel(%arg0: i32, %arg1: i32, %arg2: memref<1x32x64xf32, #tpu.memory_space<vmem>>, %arg3: memref<64x32xf32, #tpu.memory_space<vmem>>, %arg4: memref<32x64xf32, #tpu.memory_space<vmem>>, %arg5: memref<64x1xf32, #tpu.memory_space<vmem>>, %arg6: memref<1x32x64xf32, #tpu.memory_space<vmem>>, %arg7: memref<1x64x64xf32, #tpu.memory_space<vmem>>, %arg8: memref<1x1x64xf32, #tpu.memory_space<vmem>>) attributes {dimension_semantics = [#tpu.dimension_semantics<parallel>, #tpu.dimension_semantics<arbitrary>], iteration_bounds = array<i64: 2, 1>, scalar_prefetch = 0 : i64, scratch_operands = 0 : i64, tpu.core_type = #tpu.core_type<tc>, window_params = [{transform_indices = @transform_0, window_bounds = array<i64: 1, 32, 64>}, {pipeline_mode = #tpu.pipeline_mode<synchronous>, transform_indices = @transform_1, window_bounds = array<i64: 64, 32>}, {pipeline_mode = #tpu.pipeline_mode<synchronous>, transform_indices = @transform_2, window_bounds = array<i64: 32, 64>}, {pipeline_mode = #tpu.pipeline_mode<synchronous>, transform_indices = @transform_3, window_bounds = array<i64: 64, 1>}, {transform_indices = @transform_4, window_bounds = array<i64: 1, 32, 64>}, {transform_indices = @transform_5, window_bounds = array<i64: 1, 64, 64>}, {transform_indices = @transform_6, window_bounds = array<i64: 1, 1, 64>}]} {
    %c0_i32 = arith.constant 0 : i32
    %0 = arith.cmpi eq, %arg1, %c0_i32 : i32
    %1 = arith.extui %0 : i1 to i32
    %c0_i32_0 = arith.constant 0 : i32
    %2 = arith.cmpi ne, %1, %c0_i32_0 : i32
    scf.if %2 {
      %cst_29 = arith.constant 0.000000e+00 : f32
      %51 = vector.broadcast %cst_29 : f32 to vector<64x64xf32>
      %c0_30 = arith.constant 0 : index
      %c0_31 = arith.constant 0 : index
      %c0_32 = arith.constant 0 : index
      %52 = vector.load %arg7[%c0_30, %c0_31, %c0_32] : memref<1x64x64xf32, #tpu.memory_space<vmem>>, vector<1x64x64xf32>
      %53 = vector.shape_cast %52 : vector<1x64x64xf32> to vector<64x64xf32>
      %54 = vector.shape_cast %51 : vector<64x64xf32> to vector<1x64x64xf32>
      tpu.vector_store %arg7[%c0_30, %c0_31, %c0_32], %54 {strides = array<i32>} : memref<1x64x64xf32, #tpu.memory_space<vmem>>, vector<1x64x64xf32>,
      %cst_33 = arith.constant 0.000000e+00 : f32
      %55 = vector.broadcast %cst_33 : f32 to vector<1x64xf32>
      %c0_34 = arith.constant 0 : index
      %c0_35 = arith.constant 0 : index
      %c0_36 = arith.constant 0 : index
      %56 = vector.load %arg8[%c0_34, %c0_35, %c0_36] : memref<1x1x64xf32, #tpu.memory_space<vmem>>, vector<1x1x64xf32>
      %57 = vector.shape_cast %56 : vector<1x1x64xf32> to vector<1x64xf32>
      %58 = vector.shape_cast %55 : vector<1x64xf32> to vector<1x1x64xf32>
      tpu.vector_store %arg8[%c0_34, %c0_35, %c0_36], %58 {strides = array<i32>} : memref<1x1x64xf32, #tpu.memory_space<vmem>>, vector<1x1x64xf32>,
    } else {
    }
    %3 = tpu.iota {dimensions = array<i32: 0>} : vector<64x1xi32>
    %c0 = arith.constant 0 : index
    %c0_1 = arith.constant 0 : index
    %4 = vector.load %arg5[%c0, %c0_1] : memref<64x1xf32, #tpu.memory_space<vmem>>, vector<64x1xf32>
    %c0_2 = arith.constant 0 : index
    %c0_3 = arith.constant 0 : index
    %c0_4 = arith.constant 0 : index
    %5 = vector.load %arg2[%c0_2, %c0_3, %c0_4] : memref<1x32x64xf32, #tpu.memory_space<vmem>>, vector<1x32x64xf32>
    %6 = vector.shape_cast %5 : vector<1x32x64xf32> to vector<32x64xf32>
    %c0_5 = arith.constant 0 : index
    %c0_6 = arith.constant 0 : index
    %7 = vector.load %arg3[%c0_5, %c0_6] : memref<64x32xf32, #tpu.memory_space<vmem>>, vector<64x32xf32>
    %cst = arith.constant dense<0.000000e+00> : vector<64x64xf32>
    %8 = tpu.matmul %7, %6, %cst {dimension_numbers = #tpu.dot_dimension_numbers<[1], [0], [0], [1], [0, 0, 1, 1], [], []>} : vector<64x32xf32>, vector<32x64xf32>, vector<64x64xf32> -> vector<64x64xf32>
    %cst_7 = arith.constant 2.000000e+00 : f32
    %9 = vector.broadcast %cst_7 : f32 to vector<64x64xf32>
    %10 = arith.mulf %9, %8 : vector<64x64xf32>
    %11 = vector.broadcast %4 : vector<64x1xf32> to vector<64x64xf32>
    %12 = arith.subf %11, %10 : vector<64x64xf32>
    %cst_8 = arith.constant dense<0x7F800000> : vector<64xf32>
    %13 = vector.multi_reduction <minimumf>, %12, %cst_8 [0] : vector<64x64xf32> to vector<64xf32>
    %14 = vector.shape_cast %13 : vector<64xf32> to vector<1x64xf32>
    %15 = vector.broadcast %14 : vector<1x64xf32> to vector<64x64xf32>
    %16 = arith.cmpf oeq, %12, %15 : vector<64x64xf32>
    %c64_i32 = arith.constant 64 : i32
    %17 = vector.shape_cast %3 : vector<64x1xi32> to vector<64x1xi32>
    %18 = vector.broadcast %17 : vector<64x1xi32> to vector<64x64xi32>
    %19 = vector.broadcast %c64_i32 : i32 to vector<64x64xi32>
    %20 = arith.select %16, %18, %19 : vector<64x64xi1>, vector<64x64xi32>
    %cst_9 = arith.constant dense<2147483647> : vector<64xi32>
    %21 = vector.multi_reduction <minsi>, %20, %cst_9 [0] : vector<64x64xi32> to vector<64xi32>
    %22 = vector.shape_cast %21 : vector<64xi32> to vector<1x64xi32>
    %23 = vector.broadcast %3 : vector<64x1xi32> to vector<64x64xi32>
    %24 = vector.broadcast %22 : vector<1x64xi32> to vector<64x64xi32>
    %25 = arith.cmpi eq, %23, %24 : vector<64x64xi32>
    %c0_10 = arith.constant 0 : index
    %c0_11 = arith.constant 0 : index
    %26 = vector.load %arg4[%c0_10, %c0_11] : memref<32x64xf32, #tpu.memory_space<vmem>>, vector<32x64xf32>
    %27 = arith.extui %25 : vector<64x64xi1> to vector<64x64xi32>
    %28 = arith.sitofp %27 : vector<64x64xi32> to vector<64x64xf32>
    %cst_12 = arith.constant dense<0.000000e+00> : vector<32x64xf32>
    %29 = tpu.matmul %26, %28, %cst_12 {dimension_numbers = #tpu.dot_dimension_numbers<[1], [0], [0], [1], [0, 0, 1, 1], [], []>} : vector<32x64xf32>, vector<64x64xf32>, vector<32x64xf32> -> vector<32x64xf32>
    %c0_13 = arith.constant 0 : index
    %c0_14 = arith.constant 0 : index
    %c0_15 = arith.constant 0 : index
    %30 = vector.load %arg6[%c0_13, %c0_14, %c0_15] : memref<1x32x64xf32, #tpu.memory_space<vmem>>, vector<1x32x64xf32>
    %31 = vector.shape_cast %30 : vector<1x32x64xf32> to vector<32x64xf32>
    %32 = vector.shape_cast %29 : vector<32x64xf32> to vector<1x32x64xf32>
    tpu.vector_store %arg6[%c0_13, %c0_14, %c0_15], %32 {strides = array<i32>} : memref<1x32x64xf32, #tpu.memory_space<vmem>>, vector<1x32x64xf32>,
    %33 = arith.mulf %6, %6 : vector<32x64xf32>
    %cst_16 = arith.constant dense<0.000000e+00> : vector<64xf32>
    %34 = vector.multi_reduction <add>, %33, %cst_16 [0] : vector<32x64xf32> to vector<64xf32>
    %35 = vector.shape_cast %34 : vector<64xf32> to vector<1x64xf32>
    %36 = arith.addf %35, %14 : vector<1x64xf32>
    %37 = arith.extui %25 : vector<64x64xi1> to vector<64x64xi32>
    %38 = arith.sitofp %37 : vector<64x64xi32> to vector<64x64xf32>
    %c0_17 = arith.constant 0 : index
    %c0_18 = arith.constant 0 : index
    %c0_19 = arith.constant 0 : index
    %39 = vector.load %arg7[%c0_17, %c0_18, %c0_19] : memref<1x64x64xf32, #tpu.memory_space<vmem>>, vector<1x64x64xf32>
    %40 = vector.shape_cast %39 : vector<1x64x64xf32> to vector<64x64xf32>
    %41 = arith.addf %40, %38 : vector<64x64xf32>
    %c0_20 = arith.constant 0 : index
    %c0_21 = arith.constant 0 : index
    %c0_22 = arith.constant 0 : index
    %42 = vector.load %arg7[%c0_20, %c0_21, %c0_22] : memref<1x64x64xf32, #tpu.memory_space<vmem>>, vector<1x64x64xf32>
    %43 = vector.shape_cast %42 : vector<1x64x64xf32> to vector<64x64xf32>
    %44 = vector.shape_cast %41 : vector<64x64xf32> to vector<1x64x64xf32>
    tpu.vector_store %arg7[%c0_20, %c0_21, %c0_22], %44 {strides = array<i32>} : memref<1x64x64xf32, #tpu.memory_space<vmem>>, vector<1x64x64xf32>,
    %c0_23 = arith.constant 0 : index
    %c0_24 = arith.constant 0 : index
    %c0_25 = arith.constant 0 : index
    %45 = vector.load %arg8[%c0_23, %c0_24, %c0_25] : memref<1x1x64xf32, #tpu.memory_space<vmem>>, vector<1x1x64xf32>
    %46 = vector.shape_cast %45 : vector<1x1x64xf32> to vector<1x64xf32>
    %47 = arith.addf %46, %36 : vector<1x64xf32>
    %c0_26 = arith.constant 0 : index
    %c0_27 = arith.constant 0 : index
    %c0_28 = arith.constant 0 : index
    %48 = vector.load %arg8[%c0_26, %c0_27, %c0_28] : memref<1x1x64xf32, #tpu.memory_space<vmem>>, vector<1x1x64xf32>
    %49 = vector.shape_cast %48 : vector<1x1x64xf32> to vector<1x64xf32>
    %50 = vector.shape_cast %47 : vector<1x64xf32> to vector<1x1x64xf32>
    tpu.vector_store %arg8[%c0_26, %c0_27, %c0_28], %50 {strides = array<i32>} : memref<1x1x64xf32, #tpu.memory_space<vmem>>, vector<1x1x64xf32>,
    return
  }
  func.func @transform_0(%arg0: i32, %arg1: i32) -> (i32, i32, i32) {
    %c0_i32 = arith.constant 0 : i32
    %c0_i32_0 = arith.constant 0 : i32
    return %arg0, %c0_i32, %arg1 : i32, i32, i32
  }
  func.func @transform_1(%arg0: i32, %arg1: i32) -> (i32, i32) {
    %c0_i32 = arith.constant 0 : i32
    %c0_i32_0 = arith.constant 0 : i32
    %c0_i32_1 = arith.constant 0 : i32
    return %c0_i32, %c0_i32_0 : i32, i32
  }
  func.func @transform_2(%arg0: i32, %arg1: i32) -> (i32, i32) {
    %c0_i32 = arith.constant 0 : i32
    %c0_i32_0 = arith.constant 0 : i32
    %c0_i32_1 = arith.constant 0 : i32
    return %c0_i32, %c0_i32_0 : i32, i32
  }
  func.func @transform_3(%arg0: i32, %arg1: i32) -> (i32, i32) {
    %c0_i32 = arith.constant 0 : i32
    %c0_i32_0 = arith.constant 0 : i32
    %c0_i32_1 = arith.constant 0 : i32
    return %c0_i32, %c0_i32_0 : i32, i32
  }
  func.func @transform_4(%arg0: i32, %arg1: i32) -> (i32, i32, i32) {
    %c0_i32 = arith.constant 0 : i32
    %c0_i32_0 = arith.constant 0 : i32
    return %arg0, %c0_i32, %arg1 : i32, i32, i32
  }
  func.func @transform_5(%arg0: i32, %arg1: i32) -> (i32, i32, i32) {
    %c0_i32 = arith.constant 0 : i32
    %c0_i32_0 = arith.constant 0 : i32
    %c0_i32_1 = arith.constant 0 : i32
    return %arg0, %c0_i32, %c0_i32_0 : i32, i32, i32
  }
  func.func @transform_6(%arg0: i32, %arg1: i32) -> (i32, i32, i32) {
    %c0_i32 = arith.constant 0 : i32
    %c0_i32_0 = arith.constant 0 : i32
    %c0_i32_1 = arith.constant 0 : i32
    return %arg0, %c0_i32, %c0_i32_0 : i32, i32, i32
  }
}

</mosaic_0001>

<bundles_post_ra>
// kernel: tpu_custom_call.1
= control target key start
LH: loop header
LB: loop body
LE: loop exit
PB: predicated region body
PF: predicated region fallthrough
CT: control target
= control target key end

     0   :  { %s1761_s0 = inlined_call_operand.vmem [shape: f32[2,32,64], index: 0, kind: input, shape index: {}]   ;;  %s1762_s1 = inlined_call_operand.vmem [shape: f32[64,32], index: 1, kind: input, shape index: {}]   ;;  %s1763_s2 = inlined_call_operand.vmem [shape: f32[32,64], index: 2, kind: input, shape index: {}]   ;;  %s1764_s3 = inlined_call_operand.vmem [shape: f32[64,1], index: 3, kind: input, shape index: {}]   ;;  %s1765_s4 = inlined_call_operand.hbm [shape: f32[2,32,64], index: 4, kind: output, shape index: {0}]   ;;  %s1766_s5 = inlined_call_operand.hbm [shape: f32[2,64,64], index: 5, kind: output, shape index: {1}]   ;;  %s1767_s6 = inlined_call_operand.hbm [shape: f32[2,1,64], index: 6, kind: output, shape index: {2}]  }
   0x1   :  { %1769 = sst [smem:[#allocation9_spill]] %s1761_s0 }
   0x2   :  { %1770 = sst [smem:[#allocation10_spill]] %s1762_s1 }
   0x3   :  { %1771 = sst [smem:[#allocation11_spill]] %s1763_s2 }
   0x4   :  { %12 = vsyncpa [#allocation3], 0 }
   0x5   :  { %14 = vsyncpa [#allocation3 + $0x1], 0 }
   0x6   :  { %15 = vsyncpa [#allocation5], 0 }
   0x7   :  { %17 = vsyncpa [#allocation5 + $0x1], 0  ;;  %s1318_s21 = smov 0   ;;  %s1320_s22 = smov 0  }
   0x8   :  { %s1322_s23 = smov 0   ;;  %s1324_s24 = smov 0  }
   0x9   :  { %s1326_s25 = smov 0   ;;  %s1328_s26 = smov 0  }
   0xa LB: > { %s954_s27 = sadd.s32 4294967295, %s1273_s26   ;;  %s1768_s28 = sadd.s32 4294967294, %s1273_s26   ;;  %s1273_s26 = sphi %s1328_s26, %s23_s26   ;;  %s1269_s25 = sphi %s1326_s25, %s1784_s25   ;;  %s1265_s24 = sphi %s1324_s24, %s1783_s24   ;;  %s1261_s23 = sphi %s1322_s23, %s1782_s23   ;;  %s1257_s22 = sphi %s1320_s22, %s1781_s22   ;;  %s1253_s21 = sphi %s1318_s21, %s1780_s21  }
   0xb   : > { %s35_s29 = sadd.s32 1, %s1269_s25  ;;  %s135_s30 = sadd.s32 1, %s1261_s23 }
   0xc   : > { %p37_p0 = scmp.ge.s32.totalorder %s35_s29, 2  ;;  %p145_p1 = scmp.ne.s32.totalorder %s1261_s23, %s1257_s22 }
   0xd   : > { %p146_p2 = scmp.eq.s32.totalorder %s954_s27, 1  ;;  %p151_p3 = scmp.ne.s32.totalorder %s1257_s22, %s1253_s21 }
   0xe   : > { %s1786_s29 = smov (%p37_p0, %s35_s29), 0  ;;  %p152_p5 = scmp.eq.s32.totalorder %s1768_s28, 1 }
   0xf   : > { %p1360_p4 = por %p146_p2, %p145_p1  ;;  %s130_s8 = ssub.s32 %s1269_s25, %s1786_s29 }
  0x10   : > { %p958_p6 = scmp.ge.s32.totalorder %s1273_s26, 1  ;;  %p133_p7 = scmp.eq.s32.totalorder %s130_s8, 0 }
  0x11   : > { %p1369_p8 = por %p152_p5, %p151_p3  ;;  %p242_p9 = scmp.lt.s32.totalorder %s1273_s26, 3 }
  0x12   : > { %s1375_s10 = scalar_select %p133_p7, %s1261_s23, %s135_s30  }
  0x13   : > { %p243_p10 = pnand %p958_p6, %p242_p9 }
  0x14   : > { %p284_p11 = scmp.lt.s32.totalorder (!%p243_p10), %s1265_s24, 1  ;;  %s1774_s1 = sld [smem:[#allocation10_spill]] (!%p243_p10) }
  0x15   : > { %246 = sbr.rel (%p243_p10) target bundleno = 523 (0x20b), region = 36  ;;  %s1775_s0 = sld [smem:[#allocation9_spill]] (!%p243_p10) }
  0x16   : > { %s1445_s30 = sand.u32 (!%p243_p10), 1, %s1257_s22   ;;  %s1776_s2 = sld [smem:[#allocation11_spill]] (!%p243_p10) }
  0x17   : > { %s1448_s8 = scalar_lea.vmem (!%p243_p10), [#allocation6], %s1445_s30  ;;  %s1644_s20 = sand.u32 (!%p243_p10), 1, %s954_s27  }
  0x18   : > { %s1278_s27 = smov (!%p243_p10), [#allocation4]  }
  0x1a   : > { %v328_v0 = vld [vmem:[%s1774_s1] sm:$0xff]  ;;  %vm336_vm0 = vcmask 261120   ;;  %s285_s13 = scalar_select %p284_p11, %s1265_s24, 1  ;;  %v1275_v1 = vmov 0   ;;  %v318_v2 = vld [vmem:[%s1764_s3 + $0x10] sm:$0xff]  ;;  %v319_v4 = vld [vmem:[%s1764_s3 + $0x18] sm:$0xff] }
  0x1b   : > { %1035 = vmatprep.mubr.msk.f32.mxu0 %vm336_vm0, %v328_v0  ;;  %1140 = vset.pattern.permute.xlu1 %v1275_v1  ;;  %v316_v3 = vld [vmem:[%s1764_s3] sm:$0xff]  ;;  %v317_v5 = vld [vmem:[%s1764_s3 + $0x8] sm:$0xff]  ;;  %vm296_vm1 = vcmask 523264   ;;  %v323_v22 = vld [vmem:[%s1764_s3 + $0x38] sm:$0xff]  ;;  %vm305_vm2 = vcmask 516096   ;;  %v1276_v32 = vmov 0.0  }
  0x1c   : > { %1139 = vset.pattern.permute.xlu0 %v1275_v1  ;;  %486 = vperm.xlu1 %1140, %v318_v2   ;;  %s1000_s18 = sshll.u32 %s285_s13, 5  ;;  %v321_v14 = vld [vmem:[%s1764_s3 + $0x28] sm:$0xff]  ;;  %v320_v16 = vld [vmem:[%s1764_s3 + $0x20] sm:$0xff]  ;;  %v330_v24 = vld [vmem:[%s1774_s1 + $0x10] sm:$0xff]  ;;  %306 = vst.msk [vmem:[%s1448_s8] sm:$0x1] %vm305_vm2, %v1276_v32 }
  0x1d   : > { %476 = vperm.xlu0 %1139, %v316_v3   ;;  %s291_s11 = scalar_lea.vmem %s1775_s0, %s1000_s18  ;;  %v329_v21 = vld [vmem:[%s1774_s1 + $0x8] sm:$0xff]  ;;  %v322_v25 = vld [vmem:[%s1764_s3 + $0x30] sm:$0xff]  ;;  %v331_v27 = vld [vmem:[%s1774_s1 + $0x18] sm:$0xff]  ;;  %s1145_s18 = sshll.u32 %s1278_s27, 4  ;;  %s1146_s18 = int_to_ptr.vmem [resolvable:$false] %s1145_s18 }
  0x1e   : > { %v327_v6 = vld [vmem:[%s291_s11 + $0x18] sm:$0xff]  ;;  %v326_v7 = vld [vmem:[%s291_s11 + $0x10] sm:$0xff]  ;;  %v325_v8 = vld [vmem:[%s291_s11 + $0x8] sm:$0xff] }
  0x1f   : > { %1027 = vmatprep.subr.mxu0 %v327_v6  ;;  %v722_v9 = vmul.f32 %v326_v7, %v326_v7  ;;  %v721_v10 = vmul.f32 %v325_v8, %v325_v8  ;;  %v324_v11 = vld [vmem:[%s291_s11] sm:$0xff]  ;;  %v723_v12 = vmul.f32 %v327_v6, %v327_v6  ;;  %v333_v29 = vld [vmem:[%s1774_s1 + $0x28] sm:$0xff]  ;;  %v334_v30 = vld [vmem:[%s1774_s1 + $0x30] sm:$0xff]  ;;  %s960_s11 = sshll.u32 %s1445_s30, 6 }
  0x20   : > { %491 = vperm.xlu1 %1140, %v319_v4   ;;  %1028 = vmatpush3.msra.mxu0 %v327_v6  ;;  %v720_v13 = vmul.f32 %v324_v11, %v324_v11  ;;  %v332_v28 = vld [vmem:[%s1774_s1 + $0x20] sm:$0xff]  ;;  %v335_v31 = vld [vmem:[%s1774_s1 + $0x38] sm:$0xff]  ;;  %s1454_s12 = scalar_lea.vmem [#allocation4], %s960_s11  ;;  %s1002_s11 = sshll.u32 %s1265_s24, 10 }
  0x21   : > { %481 = vperm.xlu0 %1139, %v317_v5   ;;  %1029 = vmatprep.subr.mxu0 %v326_v7  ;;  %v725_v15 = vsel %vm296_vm1, %v721_v10, 0.0  ;;  %v727_v17 = vsel %vm296_vm1, %v722_v9, 0.0  ;;  %v729_v20 = vsel %vm296_vm1, %v723_v12, 0.0  ;;  %304 = vst.msk [vmem:[%s1454_s12 + $0x38] sm:$0xff] %vm296_vm1, %v1276_v32  ;;  %297 = vst.msk [vmem:[%s1454_s12] sm:$0xff] %vm296_vm1, %v1276_v32  ;;  %v599_v33 = vld [vmem:[%s1776_s2] sm:$0xff]  ;;  %s1651_s15 = scalar_lea.hbm %s1766_s5, %s1002_s11 }
  0x22   : > { %1030 = vmatpush3.msra.mxu0 %v326_v7  ;;  %v724_v18 = vsel %vm296_vm1, %v720_v13, 0.0  ;;  %298 = vst.msk [vmem:[%s1454_s12 + $0x8] sm:$0xff] %vm296_vm1, %v1276_v32  ;;  %299 = vst.msk [vmem:[%s1454_s12 + $0x10] sm:$0xff] %vm296_vm1, %v1276_v32  ;;  %1063 = vmatprep.mubr.msk.f32.mxu1 %vm296_vm1, %v599_v33  ;;  %s806_s13 = sshll.u32 %s1454_s12, 4  ;;  %s1653_s13 = int_to_ptr.vmem [resolvable:$true] %s806_s13 }
  0x23   : > { %1031 = vmatprep.subr.mxu0 %v325_v8  ;;  %v726_v19 = vadd.f32 %v725_v15, %v724_v18  ;;  %300 = vst.msk [vmem:[%s1454_s12 + $0x18] sm:$0xff] %vm296_vm1, %v1276_v32  ;;  %301 = vst.msk [vmem:[%s1454_s12 + $0x20] sm:$0xff] %vm296_vm1, %v1276_v32  ;;  %s1141_s17 = scalar_lea.vmem %s1653_s13, 1024  ;;  %p1148_p1 = scmp.lt.s32.totalorder %s1653_s13, %s1146_s18 }
  0x24   : > { %501 = vperm.xlu1 %1140, %v321_v14   ;;  %1032 = vmatpush3.msra.mxu0 %v325_v8  ;;  %302 = vst.msk [vmem:[%s1454_s12 + $0x28] sm:$0xff] %vm296_vm1, %v1276_v32  ;;  %303 = vst.msk [vmem:[%s1454_s12 + $0x30] sm:$0xff] %vm296_vm1, %v1276_v32  ;;  %p1142_p12 = scmp.ne.s32.totalorder %s1653_s13, %s1141_s17 }
  0x25   : > { %496 = vperm.xlu0 %1139, %v320_v16   ;;  %1033 = vmatprep.subr.mxu0 %v324_v11  ;;  %v728_v23 = vadd.f32 %v727_v17, %v726_v19 }
  0x26   : > { %1034 = vmatpush3.msra.mxu0 %v324_v11  ;;  %p1143_p13 = pnand %p1142_p12, %p1360_p4 }
  0x27   : > { %v1420_v26 = vadd.f32 %v729_v20, %v728_v23  ;;  %1036 = vmatmul.mubr.msk.f32.vlgmr.msra.gmra.mxu0 %vm336_vm0, %v329_v21  ;;  %v307_v21 = vlaneseq }
  0x28   : > { %511 = vperm.xlu1 %1140, %v323_v22   ;;  %1038 = vmatprep.mubr.msk.f32.mxu0 %vm336_vm0, %v330_v24  ;;  %p1144_p0 = pneg %p1143_p13 }
  0x29   : > { %506 = vperm.xlu0 %1139, %v322_v25   ;;  %v731_v1 = vrot.slane %v1420_v26, 4  ;;  %v1503_v25 = vshrl.u32 %v307_v21, 7  ;;  %v740_v21 = vld [vmem:[%s1454_s12 + $0x10] sm:$0xff] }
  0x2b   : > { %1039 = vmatmul.mubr.msk.f32.gmra.mxu0 %vm336_vm0, %v331_v27  ;;  %v732_v15 = vadd.f32 %v731_v1, %v1420_v26  ;;  %v1512_v33 = vadd.s32 8, %v1503_v25 }
  0x2c   : > { %1041 = vmatprep.mubr.msk.f32.mxu0 %vm336_vm0, %v332_v28 }
  0x2d   : > { %v733_v19 = vrot.slane %v732_v15, 2 }
  0x2f   : > { %1042 = vmatmul.mubr.msk.f32.gmra.mxu0 %vm336_vm0, %v333_v29  ;;  %v734_v23 = vadd.f32 %v733_v19, %v732_v15 }
  0x30   : > { %1044 = vmatprep.mubr.msk.f32.mxu0 %vm336_vm0, %v334_v30  ;;  %v1506_v30 = vadd.s32 16, %v1503_v25 }
  0x31   : > { %v735_v28 = vrot.slane %v734_v23, 1 }
  0x33   : > { %1045 = vmatmul.mubr.msk.f32.gmra.mxu0 %vm336_vm0, %v335_v31  ;;  %v1509_v31 = vadd.s32 48, %v1503_v25 }
  0x97   : > { %v487_v34 = vpop.permute.xlu1 %486 }
  0x98   : > { %v477_v35 = vpop.permute.xlu0 %476 }
  0x9b   : > { %v492_v37 = vpop.permute.xlu1 %491 }
  0x9c   : > { %v482_v39 = vpop.permute.xlu0 %481 }
  0x9f   : > { %v502_v42 = vpop.permute.xlu1 %501 }
  0xa0   : > { %v497_v46 = vpop.permute.xlu0 %496 }
  0xa3   : > { %v512_v58 = vpop.permute.xlu1 %511 }
  0xa4   : > { %v507_v2 = vpop.permute.xlu0 %506 }
  0xe7   : > { %v1037_v36 = vpop.f32.mrf.mxu0 }
  0xe8   : > { %v467_v47 = vmul.f32 2.0, %v1037_v36  ;;  %v1521_v36 = vadd.s32 40, %v1503_v25 }
  0xe9   : > { %v427_v38 = vpop.f32.mrf.mxu0 }
  0xea   : > { %v466_v44 = vmul.f32 2.0, %v427_v38  ;;  %v515_v57 = vsub.f32 %v482_v39, %v467_v47  ;;  %v736_v38 = vadd.f32 %v735_v28, %v734_v23  ;;  %v738_v23 = vld [vmem:[%s1454_s12] sm:$0xff] }
  0xeb   : > { %v1040_v40 = vpop.f32.mrf.mxu0 }
  0xec   : > { %v469_v48 = vmul.f32 2.0, %v1040_v40  ;;  %v1484_v53 = vsub.f32 %v477_v35, %v466_v44  ;;  %v524_v8 = vsel %vm296_vm1, %v515_v57, inf  ;;  %v1518_v35 = vadd.s32 32, %v1503_v25 }
  0xed   : > { %v437_v41 = vpop.f32.mrf.mxu0 }
  0xee   : > { %v468_v50 = vmul.f32 2.0, %v437_v41  ;;  %v517_v59 = vsub.f32 %v492_v37, %v469_v48  ;;  %v523_v3 = vsel %vm296_vm1, %v1484_v53, inf  ;;  %v1524_v37 = vadd.s32 56, %v1503_v25 }
  0xef   : > { %v1043_v43 = vpop.f32.mrf.mxu0 }
  0xf0   : > { %v471_v45 = vmul.f32 2.0, %v1043_v43  ;;  %v516_v61 = vsub.f32 %v487_v34, %v468_v50  ;;  %v526_v9 = vsel %vm296_vm1, %v517_v59, inf  ;;  %v1515_v34 = vadd.s32 24, %v1503_v25 }
  0xf1   : > { %v447_v49 = vpop.f32.mrf.mxu0 }
  0xf2   : > { %v470_v51 = vmul.f32 2.0, %v447_v49  ;;  %v1486_v54 = vsub.f32 %v502_v42, %v471_v45  ;;  %v525_v10 = vsel %vm296_vm1, %v516_v61, inf  ;;  %v762_v49 = vld [vmem:[%s1448_s8] sm:$0x1] }
  0xf3   : > { %v1046_v52 = vpop.f32.mrf.mxu0 }
  0xf4   : > { %v1488_v55 = vsub.f32 %v497_v46, %v470_v51  ;;  %v473_v56 = vmul.f32 2.0, %v1046_v52  ;;  %v529_v4 = vsel %vm296_vm1, %v1486_v54, inf }
  0xf5   : > { %v457_v60 = vpop.f32.mrf.mxu0  ;;  %v530_v12 = vmin.f32 %v524_v8, %v529_v4  ;;  %v744_v8 = vld [vmem:[%s1454_s12 + $0x30] sm:$0xff] }
  0xf6   : > { %v527_v62 = vsel %vm296_vm1, %v1488_v55, inf  ;;  %v521_v63 = vsub.f32 %v512_v58, %v473_v56  ;;  %v472_v0 = vmul.f32 2.0, %v457_v60 }
  0xf7   : > { %v528_v7 = vmin.f32 %v523_v3, %v527_v62 }
  0xf8   : > { %v533_v5 = vsel %vm296_vm1, %v521_v63, inf  ;;  %v520_v6 = vsub.f32 %v507_v2, %v472_v0 }
  0xf9   : > { %v534_v13 = vmin.f32 %v526_v9, %v533_v5  ;;  %v535_v16 = vmin.f32 %v528_v7, %v530_v12  ;;  %v743_v9 = vld [vmem:[%s1454_s12 + $0x28] sm:$0xff]  ;;  %v1277_v12 = vmov 1.0  }
  0xfa   : > { %v531_v11 = vsel %vm296_vm1, %v520_v6, inf }
  0xfb   : > { %v532_v14 = vmin.f32 %v525_v10, %v531_v11  ;;  %v742_v10 = vld [vmem:[%s1454_s12 + $0x20] sm:$0xff] }
  0xfd   : > { %v536_v17 = vmin.f32 %v532_v14, %v534_v13 }
  0xff   : > { %v537_v18 = vmin.f32 %v535_v16, %v536_v17  ;;  %v741_v16 = vld [vmem:[%s1454_s12 + $0x18] sm:$0xff] }
 0x101   : > { %v538_v20 = vrot.slane %v537_v18, 4 }
 0x103   : > { %v539_v22 = vmin.f32 %v537_v18, %v538_v20 }
 0x105   : > { %v540_v24 = vrot.slane %v539_v22, 2 }
 0x107   : > { %v541_v27 = vmin.f32 %v539_v22, %v540_v24  ;;  %v739_v22 = vld [vmem:[%s1454_s12 + $0x8] sm:$0xff] }
 0x109   : > { %v542_v29 = vrot.slane %v541_v27, 1 }
 0x10b   : > { %v543_v26 = vmin.f32 %v541_v27, %v542_v29 }
 0x10d   : > { %vm546_vm3 = vcmp.eq.f32.partialorder %v516_v61, %v543_v26  ;;  %vm550_vm4 = vcmp.eq.f32.partialorder %v520_v6, %v543_v26  ;;  %vm544_vm5 = vcmp.eq.f32.partialorder %v1484_v53, %v543_v26  ;;  %vm545_vm6 = vcmp.eq.f32.partialorder %v515_v57, %v543_v26  ;;  %v745_v6 = vld [vmem:[%s1454_s12 + $0x38] sm:$0xff] }
 0x10e   : > { %v554_v39 = vsel %vm546_vm3, %v1506_v30, 64  ;;  %v558_v40 = vsel %vm550_vm4, %v1509_v31, 64  ;;  %vm547_vm7 = vcmp.eq.f32.partialorder %v517_v59, %v543_v26  ;;  %vm548_vm8 = vcmp.eq.f32.partialorder %v1488_v55, %v543_v26 }
 0x10f   : > { %v562_v41 = vsel %vm296_vm1, %v554_v39, 2147483647  ;;  %v570_v42 = vsel %vm296_vm1, %v558_v40, 2147483647  ;;  %vm549_vm9 = vcmp.eq.f32.partialorder %v1486_v54, %v543_v26  ;;  %vm551_vm10 = vcmp.eq.f32.partialorder %v521_v63, %v543_v26 }
 0x110   : > { %vm571_vm11 = vcmp.lt.s32.totalorder %v562_v41, %v570_v42  ;;  %v552_v43 = vsel %vm544_vm5, %v1503_v25, 64  ;;  %v553_v44 = vsel %vm545_vm6, %v1512_v33, 64  ;;  %v555_v45 = vsel %vm547_vm7, %v1515_v34, 64 }
 0x111   : > { %v556_v46 = vsel %vm548_vm8, %v1518_v35, 64  ;;  %v557_v47 = vsel %vm549_vm9, %v1521_v36, 64  ;;  %v559_v48 = vsel %vm551_vm10, %v1524_v37, 64  ;;  %v560_v50 = vsel %vm296_vm1, %v552_v43, 2147483647 }
 0x112   : > { %v561_v51 = vsel %vm296_vm1, %v553_v44, 2147483647  ;;  %v563_v52 = vsel %vm296_vm1, %v555_v45, 2147483647  ;;  %v737_v53 = vadd.f32 %v736_v38, %v543_v26  ;;  %v572_v54 = vsel %vm571_vm11, %v562_v41, %v570_v42 }
 0x113   : > { %v564_v55 = vsel %vm296_vm1, %v556_v46, 2147483647  ;;  %v567_v56 = vsel %vm296_vm1, %v557_v47, 2147483647  ;;  %v573_v57 = vsel %vm296_vm1, %v559_v48, 2147483647 }
 0x114   : > { %vm565_vm12 = vcmp.lt.s32.totalorder %v560_v50, %v564_v55  ;;  %vm568_vm13 = vcmp.lt.s32.totalorder %v561_v51, %v567_v56  ;;  %vm574_vm14 = vcmp.lt.s32.totalorder %v563_v52, %v573_v57  ;;  %v763_v58 = vadd.f32 %v762_v49, %v737_v53 }
 0x115   : > { %v566_v59 = vsel %vm565_vm12, %v560_v50, %v564_v55  ;;  %v569_v60 = vsel %vm568_vm13, %v561_v51, %v567_v56  ;;  %v575_v61 = vsel %vm574_vm14, %v563_v52, %v573_v57 }
 0x116   : > { %vm576_vm15 = vcmp.lt.s32.totalorder %v566_v59, %v569_v60  ;;  %vm578_vm0 = vcmp.lt.s32.totalorder %v572_v54, %v575_v61  ;;  %765 = vst.msk [vmem:[%s1448_s8] sm:$0x1] %vm305_vm2, %v763_v58 }
 0x117   : > { %v577_v62 = vsel %vm576_vm15, %v566_v59, %v569_v60  ;;  %v579_v63 = vsel %vm578_vm0, %v572_v54, %v575_v61 }
 0x118   : > { %vm580_vm3 = vcmp.lt.s32.totalorder %v577_v62, %v579_v63 }
 0x119   : > { %v581_v0 = vsel %vm580_vm3, %v577_v62, %v579_v63 }
 0x11a   : > { %v582_v1 = vrot.slane %v581_v0, 4 }
 0x11c   : > { %vm583_vm4 = vcmp.lt.s32.totalorder %v581_v0, %v582_v1 }
 0x11d   : > { %v584_v2 = vsel %vm583_vm4, %v581_v0, %v582_v1 }
 0x11e   : > { %v585_v3 = vrot.slane %v584_v2, 2 }
 0x120   : > { %vm586_vm5 = vcmp.lt.s32.totalorder %v584_v2, %v585_v3 }
 0x121   : > { %v587_v4 = vsel %vm586_vm5, %v584_v2, %v585_v3 }
 0x122   : > { %v588_v5 = vrot.slane %v587_v4, 1 }
 0x124   : > { %vm589_vm6 = vcmp.lt.s32.totalorder %v587_v4, %v588_v5 }
 0x125   : > { %v590_v7 = vsel %vm589_vm6, %v587_v4, %v588_v5 }
 0x126   : > { %vm598_vm2 = vcmp.eq.s32.totalorder %v1524_v37, %v590_v7  ;;  %vm597_vm7 = vcmp.eq.s32.totalorder %v1509_v31, %v590_v7  ;;  %vm596_vm8 = vcmp.eq.s32.totalorder %v1521_v36, %v590_v7  ;;  %vm595_vm9 = vcmp.eq.s32.totalorder %v1518_v35, %v590_v7 }
 0x127   : > { %v978_v11 = vsel %vm598_vm2, 1.0, %v1276_v32  ;;  %1047 = vmatprep.subr.msk.mxu1 %vm598_vm2, %v1277_v12  ;;  %v977_v13 = vsel %vm597_vm7, 1.0, %v1276_v32  ;;  %v976_v14 = vsel %vm596_vm8, 1.0, %v1276_v32  ;;  %v975_v15 = vsel %vm595_vm9, 1.0, %v1276_v32 }
 0x128   : > { %v753_v17 = vadd.f32 %v978_v11, %v745_v6  ;;  %1048 = vmatpush3.msk.msra.mxu1 %vm598_vm2, %v1277_v12  ;;  %v752_v18 = vadd.f32 %v977_v13, %v744_v8  ;;  %v751_v19 = vadd.f32 %v976_v14, %v743_v9  ;;  %v750_v20 = vadd.f32 %v975_v15, %v742_v10 }
 0x129   : > { %1049 = vmatprep.subr.msk.mxu1 %vm597_vm7, %v1277_v12  ;;  %vm594_vm10 = vcmp.eq.s32.totalorder %v1515_v34, %v590_v7  ;;  %vm593_vm11 = vcmp.eq.s32.totalorder %v1506_v30, %v590_v7  ;;  %vm592_vm12 = vcmp.eq.s32.totalorder %v1512_v33, %v590_v7  ;;  %vm591_vm13 = vcmp.eq.s32.totalorder %v1503_v25, %v590_v7  ;;  %v601_v34 = vld [vmem:[%s1776_s2 + $0x10] sm:$0xff]  ;;  %v602_v30 = vld [vmem:[%s1776_s2 + $0x18] sm:$0xff] }
 0x12a   : > { %761 = vst.msk [vmem:[%s1454_s12 + $0x38] sm:$0xff] %vm296_vm1, %v753_v17  ;;  %760 = vst.msk [vmem:[%s1454_s12 + $0x30] sm:$0xff] %vm296_vm1, %v752_v18  ;;  %1050 = vmatpush3.msk.msra.mxu1 %vm597_vm7, %v1277_v12  ;;  %v974_v24 = vsel %vm594_vm10, 1.0, %v1276_v32  ;;  %v973_v27 = vsel %vm593_vm11, 1.0, %v1276_v32  ;;  %v972_v28 = vsel %vm592_vm12, 1.0, %v1276_v32  ;;  %v971_v29 = vsel %vm591_vm13, 1.0, %v1276_v32 }
 0x12b   : > { %759 = vst.msk [vmem:[%s1454_s12 + $0x28] sm:$0xff] %vm296_vm1, %v751_v19  ;;  %758 = vst.msk [vmem:[%s1454_s12 + $0x20] sm:$0xff] %vm296_vm1, %v750_v20  ;;  %1051 = vmatprep.subr.msk.mxu1 %vm596_vm8, %v1277_v12  ;;  %v749_v31 = vadd.f32 %v974_v24, %v741_v16  ;;  %v748_v26 = vadd.f32 %v973_v27, %v740_v21  ;;  %v747_v37 = vadd.f32 %v972_v28, %v739_v22  ;;  %v600_v32 = vld [vmem:[%s1776_s2 + $0x8] sm:$0xff] }
 0x12c   : > { %v746_v38 = vadd.f32 %v971_v29, %v738_v23  ;;  %1052 = vmatpush3.msk.msra.mxu1 %vm596_vm8, %v1277_v12 }
 0x12d   : > { %1053 = vmatprep.subr.msk.mxu1 %vm595_vm9, %v1277_v12  ;;  %757 = vst.msk [vmem:[%s1454_s12 + $0x18] sm:$0xff] %vm296_vm1, %v749_v31  ;;  %756 = vst.msk [vmem:[%s1454_s12 + $0x10] sm:$0xff] %vm296_vm1, %v748_v26 }
 0x12e   : > { %755 = vst.msk [vmem:[%s1454_s12 + $0x8] sm:$0xff] %vm296_vm1, %v747_v37  ;;  %754 = vst.msk [vmem:[%s1454_s12] sm:$0xff] %vm296_vm1, %v746_v38  ;;  %1054 = vmatpush3.msk.msra.mxu1 %vm595_vm9, %v1277_v12  ;;  %s1147_s12 = scalar_lea.vmem %s1146_s18, 2048 }
 0x12f   : > { %1055 = vmatprep.subr.msk.mxu1 %vm594_vm10, %v1277_v12  ;;  %p1149_p2 = scmp.lt.s32.totalorder %s1147_s12, %s1141_s17 }
 0x130   : > { %1056 = vmatpush3.msk.msra.mxu1 %vm594_vm10, %v1277_v12 }
 0x131   : > { %1057 = vmatprep.subr.msk.mxu1 %vm593_vm11, %v1277_v12  ;;  %p1150_p3 = por %p1149_p2, %p1148_p1 }
 0x132   : > { %1058 = vmatpush3.msk.msra.mxu1 %vm593_vm11, %v1277_v12 }
 0x133   : > { %1059 = vmatprep.subr.msk.mxu1 %vm592_vm12, %v1277_v12  ;;  %p1151_p5 = pnand %p1150_p3, %p1144_p0 }
 0x134   : > { %1060 = vmatpush3.msk.msra.mxu1 %vm592_vm12, %v1277_v12 }
 0x135   : > { %1061 = vmatprep.subr.msk.mxu1 %vm591_vm13, %v1277_v12 }
 0x136   : > { %1062 = vmatpush3.msk.msra.mxu1 %vm591_vm13, %v1277_v12 }
 0x137   : > { %1064 = vmatmul.mubr.msk.f32.vlgmr.msra.gmra.mxu1 %vm296_vm1, %v600_v32 }
 0x138   : > { %1066 = vmatprep.mubr.msk.f32.mxu1 %vm296_vm1, %v601_v34 }
 0x13b   : > { %1067 = vmatmul.mubr.msk.f32.gmra.mxu1 %vm296_vm1, %v602_v30 }
 0x13c   : > { %1154 = shalt.err (!%p1151_p5)
}
 0x13d   : > { %s1155_s19 = scalar_lea.hbm %s1651_s15, 1024  ;;  %s1159_s28 = scalar_lea.hbm %s1766_s5, 2048 }
 0x13e   : > { %p1156_p6 = scmp.ne.s32.totalorder %s1651_s15, %s1155_s19  ;;  %p1160_p10 = scmp.lt.s32.totalorder %s1651_s15, %s1766_s5 }
 0x13f   : > { %p1161_p11 = scmp.lt.s32.totalorder %s1159_s28, %s1155_s19 }
 0x140   : > { %p1157_p7 = pnand %p1156_p6, %p1360_p4 }
 0x141   : > { %p1162_p12 = por %p1161_p11, %p1160_p10 }
 0x142   : > { %p1158_p9 = pneg %p1157_p7 }
 0x144   : > { %p1163_p13 = pnand %p1162_p12, %p1158_p9 }
 0x146   : > { %1166 = shalt.err (!%p1163_p13)
}
 0x147   : > { %s1279_s17 = smov 128   ;;  %s1280_s18 = smov 8  }
 0x148   : > { %s1777_s12 = scalar_lea.sflag [#allocation5], %s1644_s20  ;;  %s997_s16 = sshll.u32 %s1265_s24, 4 }
 0x149   : > { %1070 = dma.vmem_to_hbm [thread:$0]  (%p1360_p4), %s1653_s13, 1024, %s1651_s15, %s1777_s12, %s1279_s17, %s1279_s17, %s1280_s18  }
 0x14a   : > { %s820_s14 = scalar_lea.hbm %s1767_s6, %s997_s16  ;;  %s822_s28 = sshll.u32 %s1448_s8, 4  ;;  %s823_s28 = int_to_ptr.vmem [resolvable:$true] %s822_s28 }
 0x14b   : > { %s1167_s27 = scalar_lea.vmem %s823_s28, 16  ;;  %s1281_s0 = smov [#allocation6]  }
 0x14c   : > { %p1168_p0 = scmp.ne.s32.totalorder %s823_s28, %s1167_s27  ;;  %s1171_s1 = sshll.u32 %s1281_s0, 4  ;;  %s1172_s1 = int_to_ptr.vmem [resolvable:$false] %s1171_s1 }
 0x14d   : > { %s1173_s2 = scalar_lea.vmem %s1172_s1, 32  ;;  %p1174_p3 = scmp.lt.s32.totalorder %s823_s28, %s1172_s1 }
 0x14e   : > { %p1169_p1 = pnand %p1168_p0, %p1360_p4  ;;  %p1175_p5 = scmp.lt.s32.totalorder %s1173_s2, %s1167_s27 }
 0x150   : > { %p1170_p2 = pneg %p1169_p1  ;;  %p1176_p6 = por %p1175_p5, %p1174_p3 }
 0x152   : > { %p1177_p7 = pnand %p1176_p6, %p1170_p2 }
 0x154   : > { %1180 = shalt.err (!%p1177_p7)
}
 0x155   : > { %s1181_s13 = scalar_lea.hbm %s820_s14, 16  ;;  %s1185_s12 = scalar_lea.hbm %s1767_s6, 32 }
 0x156   : > { %p1182_p9 = scmp.ne.s32.totalorder %s820_s14, %s1181_s13  ;;  %p1186_p12 = scmp.lt.s32.totalorder %s820_s14, %s1767_s6 }
 0x157   : > { %p1187_p13 = scmp.lt.s32.totalorder %s1185_s12, %s1181_s13 }
 0x158   : > { %p1183_p10 = pnand %p1182_p9, %p1360_p4 }
 0x159   : > { %p1188_p0 = por %p1187_p13, %p1186_p12 }
 0x15a   : > { %p1184_p11 = pneg %p1183_p10 }
 0x15c   : > { %p1189_p1 = pnand %p1188_p0, %p1184_p11 }
 0x15e   : > { %1192 = shalt.err (!%p1189_p1)
}
 0x15f   : > { %s1778_s0 = scalar_lea.sflag [#allocation5], %s1644_s20  ;;  %s959_s1 = sshll.u32 %s1445_s30, 5 }
 0x160   : > { %1071 = dma.vmem_to_hbm [thread:$0]  (%p1360_p4), %s823_s28, 16, %s820_s14, %s1778_s0  }
 0x161   : > { %s270_s2 = scalar_lea.vmem [#allocation2], %s959_s1  ;;  %s1001_s27 = sshll.u32 %s1265_s24, 9 }
 0x162   : > { %s790_s11 = sshll.u32 %s270_s2, 4  ;;  %s1710_s28 = scalar_lea.hbm %s1765_s4, %s1001_s27  ;;  %s1704_s11 = int_to_ptr.vmem [resolvable:$true] %s790_s11 }
 0x163   : > { %s767_s13 = scalar_lea.sflag [#allocation3], %s1445_s30  ;;  %s1193_s24 = scalar_lea.vmem %s1704_s11, 512 }
 0x164   : > { %p1194_p2 = scmp.ne.s32.totalorder %s1704_s11, %s1193_s24  ;;  %s1282_s8 = smov [#allocation2]  }
 0x165   : > { %s1197_s15 = sshll.u32 %s1282_s8, 4  ;;  %s1198_s15 = int_to_ptr.vmem [resolvable:$false] %s1197_s15 }
 0x166   : > { %p1195_p3 = pnand %p1194_p2, %p1360_p4  ;;  %s1199_s12 = scalar_lea.vmem %s1198_s15, 1024 }
 0x167   : > { %p1200_p6 = scmp.lt.s32.totalorder %s1704_s11, %s1198_s15  ;;  %p1201_p7 = scmp.lt.s32.totalorder %s1199_s12, %s1193_s24 }
 0x168   : > { %p1196_p5 = pneg %p1195_p3 }
 0x169   : > { %p1202_p9 = por %p1201_p7, %p1200_p6 }
 0x16b   : > { %p1203_p10 = pnand %p1202_p9, %p1196_p5 }
 0x1f7   : > { %v1065_v25 = vpop.f32.mrf.mxu1 }
 0x1f8   : > { %717 = vst.msk [vmem:[%s270_s2 + $0x8] sm:$0xff] %vm296_vm1, %v1065_v25 }
 0x1f9   : > { %v697_v33 = vpop.f32.mrf.mxu1 }
 0x1fa   : > { %716 = vst.msk [vmem:[%s270_s2] sm:$0xff] %vm296_vm1, %v697_v33 }
 0x1fb   : > { %v1068_v35 = vpop.f32.mrf.mxu1 }
 0x1fc   : > { %719 = vst.msk [vmem:[%s270_s2 + $0x18] sm:$0xff] %vm296_vm1, %v1068_v35 }
 0x1fd   : > { %v707_v36 = vpop.f32.mrf.mxu1 }
 0x1fe   : > { %718 = vst.msk [vmem:[%s270_s2 + $0x10] sm:$0xff] %vm296_vm1, %v707_v36 }
 0x1ff   : > { %1206 = shalt.err (!%p1203_p10)
}
 0x200   : > { %s1207_s16 = scalar_lea.hbm %s1710_s28, 512  ;;  %s1211_s0 = scalar_lea.hbm %s1765_s4, 1024 }
 0x201   : > { %p1208_p11 = scmp.ne.s32.totalorder %s1710_s28, %s1207_s16  ;;  %p1212_p0 = scmp.lt.s32.totalorder %s1710_s28, %s1765_s4 }
 0x202   : > { %p1213_p1 = scmp.lt.s32.totalorder %s1211_s0, %s1207_s16 }
 0x203   : > { %p1209_p12 = pnand %p1208_p11, %p1360_p4 }
 0x204   : > { %p1214_p2 = por %p1213_p1, %p1212_p0 }
 0x205   : > { %p1210_p13 = pneg %p1209_p12 }
 0x207   : > { %p1215_p3 = pnand %p1214_p2, %p1210_p13 }
 0x209   : > { %1218 = shalt.err (!%p1215_p3)
}
 0x20a   : > { %1069 = dma.vmem_to_hbm [thread:$0]  (%p1360_p4), %s1704_s11, 512, %s1710_s28, %s767_s13, %s1279_s17, %s1279_s17, %s1280_s18  }
 0x20b PF: > { %p1085_p5 = scmp.ge.s32.totalorder %s1273_s26, 2  ;;  %s834_s27 = sand.u32 1, %s1253_s21  }
 0x20c   : > { %s835_s20 = scalar_lea.sflag [#allocation3], %s834_s27 }
 0x20d   : > { %p1076_p6 = pnand %p1085_p5, %p1369_p8 }
 0x20f   : > { %p1077_p7 = pneg %p1076_p6 }
 0x211   : > { %1244 = dma.done.wait (%p1077_p7), %s835_s20, 512  }
 0x212   : > { %1246 = vsyncadd (%p1077_p7), %s835_s20, 4294966784  ;;  %s1779_s7 = sadd.s32 4294967294, %s1273_s26  }
 0x213   : > { %s843_s14 = sand.u32 1, %s1779_s7  }
 0x214   : > { %s844_s24 = scalar_lea.sflag [#allocation5], %s843_s14 }
 0x215   : > { %1248 = dma.done.wait (%p1077_p7), %s844_s24, 1040  }
 0x216   : > { %1250 = vsyncadd (%p1077_p7), %s844_s24, 4294966256  ;;  %s23_s26 = sadd.s32 1, %s1273_s26   ;;  %s1780_s21 = smov %s1257_s22 }
 0x217   : > { %p20_p4 = scmp.ge.s32.totalorder %s23_s26, 4   ;;  %s1781_s22 = smov %s1261_s23 }
 0x218   : > { %s1782_s23 = smov %s1375_s10  ;;  %s1783_s24 = smov %s1269_s25 }
 0x219   : > { %s1784_s25 = smov %s1786_s29  ;;  %22 = sbr.rel (!%p20_p4) target bundleno = 10 (0xa), region = 107 }
 0x21e   :  { %857 = vsyncpa [#allocation3], 1 }
 0x21f   :  { %859 = vsyncpa [#allocation3 + $0x1], 1 }
 0x220   :  { %860 = vsyncpa [#allocation5], 1 }
 0x221   :  { %862 = vsyncpa [#allocation5 + $0x1], 1 }

</bundles_post_ra>
